<compile_context>
chip_gen: v6e
topology: v6e:2x2x1
jax: 0.10.0
libtpu: 0.0.40
codegen_flags: <defaults>
</compile_context>

<pallas_src>
import functools

import jax
import jax.numpy as jnp
from jax.experimental import pallas as pl
from jax.experimental.pallas import tpu as pltpu

BN_EPS = 1e-5
LEAKY_SLOPE = 0.2


def _round_up(x, m):
    return ((x + m - 1) // m) * m


# ---------------------------------------------------------------------------
# Pallas kernel: fused GEMM (bf16 in, f32 acc) + per-channel shift + leaky ReLU
# ---------------------------------------------------------------------------
def _convblock_kernel(p_ref, w_ref, shift_ref, o_ref, *, neg_slope, apply_act):
    # p_ref: (TM, Kp) bf16 patches, w_ref: (Kp, OCp) bf16, shift: (1, OCp) f32,
    # o_ref: (TM, OCp) f32.
    y = jnp.dot(p_ref[...], w_ref[...], preferred_element_type=jnp.float32)
    y = y + shift_ref[...]
    if apply_act:
        y = jnp.where(y >= 0.0, y, neg_slope * y)
    o_ref[...] = y.astype(o_ref.dtype)


# ---------------------------------------------------------------------------
# im2col on an NHWC tensor (kept in plain JAX; stays NHWC across layers)
# ---------------------------------------------------------------------------
def _im2col_nhwc(x_nhwc, kh, kw, stride, pad):
    x = jnp.pad(x_nhwc, ((0, 0), (pad, pad), (pad, pad), (0, 0)))
    n, h, w, c = x.shape
    oh = (h - kh) // stride + 1
    ow = (w - kw) // stride + 1
    cols = []
    for i in range(kh):
        for j in range(kw):
            cols.append(x[:, i:i + stride * oh:stride, j:j + stride * ow:stride, :])
    patches = jnp.concatenate(cols, axis=-1)  # (N, OH, OW, KH*KW*C), K order: (kh, kw, c)
    return patches.reshape(n * oh * ow, kh * kw * c), n, oh, ow


# ---------------------------------------------------------------------------
# One ConvBlock forward using packed (pre-padded, pre-folded) parameters
# ---------------------------------------------------------------------------
def conv_block_pallas(x_nhwc, pp):
    patches, n, oh, ow = _im2col_nhwc(x_nhwc, pp["kh"], pp["kw"], pp["stride"], pp["pad"])
    m = patches.shape[0]
    k_dim, k_pad = pp["k_dim"], pp["k_pad"]
    oc, oc_pad = pp["oc"], pp["oc_pad"]

    # Large M tile (multiple of 16 for bf16 sublane packing), capped at 256.
    tm = 256
    if m < tm:
        tm = _round_up(m, 16)
    m_pad = _round_up(m, tm)

    patches = jnp.pad(patches, ((0, m_pad - m), (0, k_pad - k_dim))).astype(jnp.bfloat16)

    out = pl.pallas_call(
        functools.partial(
            _convblock_kernel,
            neg_slope=LEAKY_SLOPE,
            apply_act=(pp["act"] == "leaky_relu"),
        ),
        grid=(m_pad // tm,),
        in_specs=[
            pl.BlockSpec((tm, k_pad), lambda i: (i, 0)),
            pl.BlockSpec((k_pad, oc_pad), lambda i: (0, 0)),
            pl.BlockSpec((1, oc_pad), lambda i: (0, 0)),
        ],
        out_specs=pl.BlockSpec((tm, oc_pad), lambda i: (i, 0)),
        out_shape=jax.ShapeDtypeStruct((m_pad, oc_pad), jnp.float32),
        compiler_params=pltpu.CompilerParams(dimension_semantics=("parallel",)),
    )(patches, pp["w2d"], pp["shift"])

    out = out[:m, :oc].reshape(n, oh, ow, oc)  # stay NHWC
    return out


# ---------------------------------------------------------------------------
# Parameter construction (matches EncodeLayer's layer config) and one-time packing
# ---------------------------------------------------------------------------
def init_encode_layer(key, in_c, out_c, basic_c, layers_num, activate=None):
    max_c = basic_c * 2 ** layers_num
    cfgs = [dict(ic=in_c, oc=basic_c, stride=2, pad=1, bn=True, act="leaky_relu")]
    cur_in, cur_b = in_c, basic_c
    for _ in range(1, layers_num):
        cur_in = cur_b
        cur_b = min(2 * cur_in, max_c)
        cfgs.append(dict(ic=cur_in, oc=cur_b, stride=2, pad=1, bn=True, act="leaky_relu"))
    cfgs.append(dict(ic=cur_b, oc=min(cur_b * 2, max_c), stride=1, pad=2, bn=True, act="leaky_relu"))
    cfgs.append(dict(ic=min(cur_b * 2, max_c), oc=out_c, stride=1, pad=1, bn=False, act=activate))

    params = []
    for cfg in cfgs:
        key, k1, k2, k3, k4, k5, k6 = jax.random.split(key, 7)
        w = jax.random.normal(k1, (cfg["oc"], cfg["ic"], 4, 4), jnp.float32) * 0.05
        b = jax.random.normal(k2, (cfg["oc"],), jnp.float32) * 0.05
        if cfg["bn"]:
            bn = (
                1.0 + 0.1 * jax.random.normal(k3, (cfg["oc"],), jnp.float32),   # gamma
                0.1 * jax.random.normal(k4, (cfg["oc"],), jnp.float32),          # beta
                0.1 * jax.random.normal(k5, (cfg["oc"],), jnp.float32),          # running_mean
                1.0 + 0.1 * jnp.abs(jax.random.normal(k6, (cfg["oc"],), jnp.float32)),  # running_var
            )
        else:
            bn = None
        params.append(dict(w=w, b=b, bn=bn, stride=cfg["stride"], pad=cfg["pad"], act=cfg["act"]))
    return params


def pack_encode_layer(params):
    """One-time prep: transpose/reshape weights, fold BN scale into weights, fold bias+BN
    shift into a single per-channel shift, zero-pad K/OC to lane width, cast to bf16."""
    packed = []
    for p in params:
        w, b, bn = p["w"], p["b"], p["bn"]
        oc, ic, kh, kw = w.shape
        k_dim = kh * kw * ic
        # PyTorch (OC, IC, KH, KW) -> (KH, KW, IC, OC) -> (K, OC) matching im2col K order.
        w2d = jnp.transpose(w, (2, 3, 1, 0)).reshape(k_dim, oc).astype(jnp.float32)
        if bn is not None:
            gamma, beta, mean, var = bn
            s = gamma / jnp.sqrt(var + BN_EPS)
            shift = b * s + beta - mean * s
            w2d = w2d * s[None, :]          # fold BN scale into the GEMM weight
        else:
            shift = b
        k_pad = _round_up(k_dim, 128)
        oc_pad = _round_up(oc, 128)
        w2d = jnp.pad(w2d, ((0, k_pad - k_dim), (0, oc_pad - oc))).astype(jnp.bfloat16)
        shift = jnp.pad(shift.astype(jnp.float32), (0, oc_pad - oc)).reshape(1, oc_pad)
        packed.append(dict(
            w2d=w2d, shift=shift, oc=oc, kh=kh, kw=kw, k_dim=k_dim,
            k_pad=k_pad, oc_pad=oc_pad, stride=p["stride"], pad=p["pad"], act=p["act"],
        ))
    return packed


def encode_layer_forward(x_nchw, packed):
    """Forward: NCHW in (PyTorch convention); internally NHWC; returns NCHW features."""
    x = jnp.transpose(x_nchw, (0, 2, 3, 1))  # NCHW -> NHWC once
    features = []
    for pp in packed:
        x = conv_block_pallas(x, pp)
        features.append(jnp.transpose(x, (0, 3, 1, 2)))  # returned features are NCHW
    return features


# ---------------------------------------------------------------------------
# Pure-JAX reference for verification (fp32)
# ---------------------------------------------------------------------------
def _conv_block_ref(x, p):
    y = jax.lax.conv_general_dilated(
        x, p["w"], (p["stride"], p["stride"]),
        [(p["pad"], p["pad"]), (p["pad"], p["pad"])],
        dimension_numbers=("NCHW", "OIHW", "NCHW"),
    )
    y = y + p["b"][None, :, None, None]
    if p["bn"] is not None:
        g, beta, m, v = p["bn"]
        y = g[None, :, None, None] * (y - m[None, :, None, None]) / jnp.sqrt(
            v[None, :, None, None] + BN_EPS
        ) + beta[None, :, None, None]
    if p["act"] == "leaky_relu":
        y = jnp.where(y >= 0.0, y, LEAKY_SLOPE * y)
    return y


def _encode_layer_ref(x, params):
    feats = []
    for p in params:
        x = _conv_block_ref(x, p)
        feats.append(x)
    return feats


if __name__ == "__main__":
    key = jax.random.PRNGKey(0)
    k_param, k_x = jax.random.split(key)

    # EncodeLayer(in_c=4, out_c=1, basic_c=8, layers_num=2, activate=None)
    in_c, out_c, basic_c, layers_num = 4, 1, 8, 2
    params = init_encode_layer(k_param, in_c, out_c, basic_c, layers_num, activate=None)
    packed = pack_encode_layer(params)

    x = jax.random.normal(k_x, (2, in_c, 16, 16), jnp.float32)  # NCHW, like PyTorch

    fwd = jax.jit(lambda inp: encode_layer_forward(inp, packed))
    feats = fwd(x)
    feats = [jax.block_until_ready(f) for f in feats]

    # Sanity-check against pure-fp32 reference (bf16 GEMM inputs -> relaxed tolerance).
    refs = _encode_layer_ref(x, params)
    for f, r in zip(feats, refs):
        assert f.shape == r.shape, (f.shape, r.shape)
        err = float(jnp.max(jnp.abs(f - r)))
        assert jnp.allclose(f, r, atol=3e-2, rtol=3e-2), err

    print("KERNEL_OK")
</pallas_src>

<mosaic_0001>
module attributes {stable_mosaic.version = 11 : i64} {
  func.func @_convblock_kernel(%arg0: i32, %arg1: memref<128x128xbf16, #tpu.memory_space<vmem>>, %arg2: memref<128x128xbf16, #tpu.memory_space<vmem>>, %arg3: memref<1x128xf32, #tpu.memory_space<vmem>>, %arg4: memref<128x128xf32, #tpu.memory_space<vmem>>) attributes {dimension_semantics = [#tpu.dimension_semantics<parallel>], iteration_bounds = array<i64: 1>, scalar_prefetch = 0 : i64, scratch_operands = 0 : i64, tpu.core_type = #tpu.core_type<tc>, window_params = [{transform_indices = @transform_0, window_bounds = array<i64: 128, 128>}, {pipeline_mode = #tpu.pipeline_mode<synchronous>, transform_indices = @transform_1, window_bounds = array<i64: 128, 128>}, {pipeline_mode = #tpu.pipeline_mode<synchronous>, transform_indices = @transform_2, window_bounds = array<i64: 1, 128>}, {transform_indices = @transform_3, window_bounds = array<i64: 128, 128>}]} {
    %c0 = arith.constant 0 : index
    %c0_0 = arith.constant 0 : index
    %0 = vector.load %arg1[%c0, %c0_0] : memref<128x128xbf16, #tpu.memory_space<vmem>>, vector<128x128xbf16>
    %c0_1 = arith.constant 0 : index
    %c0_2 = arith.constant 0 : index
    %1 = vector.load %arg2[%c0_1, %c0_2] : memref<128x128xbf16, #tpu.memory_space<vmem>>, vector<128x128xbf16>
    %cst = arith.constant dense<0.000000e+00> : vector<128x128xf32>
    %2 = tpu.matmul %0, %1, %cst {dimension_numbers = #tpu.dot_dimension_numbers<[1], [0], [0], [1], [0, 0, 1, 1], [], []>} : vector<128x128xbf16>, vector<128x128xbf16>, vector<128x128xf32> -> vector<128x128xf32>
    %c0_3 = arith.constant 0 : index
    %c0_4 = arith.constant 0 : index
    %3 = vector.load %arg3[%c0_3, %c0_4] : memref<1x128xf32, #tpu.memory_space<vmem>>, vector<1x128xf32>
    %4 = vector.broadcast %3 : vector<1x128xf32> to vector<128x128xf32>
    %5 = arith.addf %2, %4 : vector<128x128xf32>
    %cst_5 = arith.constant 0.000000e+00 : f32
    %6 = vector.broadcast %cst_5 : f32 to vector<128x128xf32>
    %7 = arith.cmpf oge, %5, %6 : vector<128x128xf32>
    %cst_6 = arith.constant 2.000000e-01 : f32
    %8 = vector.broadcast %cst_6 : f32 to vector<128x128xf32>
    %9 = arith.mulf %8, %5 : vector<128x128xf32>
    %10 = arith.select %7, %5, %9 : vector<128x128xi1>, vector<128x128xf32>
    %c0_7 = arith.constant 0 : index
    %c0_8 = arith.constant 0 : index
    %11 = vector.load %arg4[%c0_7, %c0_8] : memref<128x128xf32, #tpu.memory_space<vmem>>, vector<128x128xf32>
    tpu.vector_store %arg4[%c0_7, %c0_8], %10 {strides = array<i32>} : memref<128x128xf32, #tpu.memory_space<vmem>>, vector<128x128xf32>,
    return
  }
  func.func @transform_0(%arg0: i32) -> (i32, i32) {
    %c0_i32 = arith.constant 0 : i32
    %c0_i32_0 = arith.constant 0 : i32
    return %arg0, %c0_i32 : i32, i32
  }
  func.func @transform_1(%arg0: i32) -> (i32, i32) {
    %c0_i32 = arith.constant 0 : i32
    %c0_i32_0 = arith.constant 0 : i32
    %c0_i32_1 = arith.constant 0 : i32
    return %c0_i32, %c0_i32_0 : i32, i32
  }
  func.func @transform_2(%arg0: i32) -> (i32, i32) {
    %c0_i32 = arith.constant 0 : i32
    %c0_i32_0 = arith.constant 0 : i32
    %c0_i32_1 = arith.constant 0 : i32
    return %c0_i32, %c0_i32_0 : i32, i32
  }
  func.func @transform_3(%arg0: i32) -> (i32, i32) {
    %c0_i32 = arith.constant 0 : i32
    %c0_i32_0 = arith.constant 0 : i32
    return %arg0, %c0_i32 : i32, i32
  }
}

module attributes {stable_mosaic.version = 11 : i64} {
  func.func @_convblock_kernel(%arg0: i32, %arg1: memref<32x128xbf16, #tpu.memory_space<vmem>>, %arg2: memref<128x128xbf16, #tpu.memory_space<vmem>>, %arg3: memref<1x128xf32, #tpu.memory_space<vmem>>, %arg4: memref<32x128xf32, #tpu.memory_space<vmem>>) attributes {dimension_semantics = [#tpu.dimension_semantics<parallel>], iteration_bounds = array<i64: 1>, scalar_prefetch = 0 : i64, scratch_operands = 0 : i64, tpu.core_type = #tpu.core_type<tc>, window_params = [{transform_indices = @transform_0, window_bounds = array<i64: 32, 128>}, {pipeline_mode = #tpu.pipeline_mode<synchronous>, transform_indices = @transform_1, window_bounds = array<i64: 128, 128>}, {pipeline_mode = #tpu.pipeline_mode<synchronous>, transform_indices = @transform_2, window_bounds = array<i64: 1, 128>}, {transform_indices = @transform_3, window_bounds = array<i64: 32, 128>}]} {
    %c0 = arith.constant 0 : index
    %c0_0 = arith.constant 0 : index
    %0 = vector.load %arg1[%c0, %c0_0] : memref<32x128xbf16, #tpu.memory_space<vmem>>, vector<32x128xbf16>
    %c0_1 = arith.constant 0 : index
    %c0_2 = arith.constant 0 : index
    %1 = vector.load %arg2[%c0_1, %c0_2] : memref<128x128xbf16, #tpu.memory_space<vmem>>, vector<128x128xbf16>
    %cst = arith.constant dense<0.000000e+00> : vector<32x128xf32>
    %2 = tpu.matmul %0, %1, %cst {dimension_numbers = #tpu.dot_dimension_numbers<[1], [0], [0], [1], [0, 0, 1, 1], [], []>} : vector<32x128xbf16>, vector<128x128xbf16>, vector<32x128xf32> -> vector<32x128xf32>
    %c0_3 = arith.constant 0 : index
    %c0_4 = arith.constant 0 : index
    %3 = vector.load %arg3[%c0_3, %c0_4] : memref<1x128xf32, #tpu.memory_space<vmem>>, vector<1x128xf32>
    %4 = vector.broadcast %3 : vector<1x128xf32> to vector<32x128xf32>
    %5 = arith.addf %2, %4 : vector<32x128xf32>
    %cst_5 = arith.constant 0.000000e+00 : f32
    %6 = vector.broadcast %cst_5 : f32 to vector<32x128xf32>
    %7 = arith.cmpf oge, %5, %6 : vector<32x128xf32>
    %cst_6 = arith.constant 2.000000e-01 : f32
    %8 = vector.broadcast %cst_6 : f32 to vector<32x128xf32>
    %9 = arith.mulf %8, %5 : vector<32x128xf32>
    %10 = arith.select %7, %5, %9 : vector<32x128xi1>, vector<32x128xf32>
    %c0_7 = arith.constant 0 : index
    %c0_8 = arith.constant 0 : index
    %11 = vector.load %arg4[%c0_7, %c0_8] : memref<32x128xf32, #tpu.memory_space<vmem>>, vector<32x128xf32>
    tpu.vector_store %arg4[%c0_7, %c0_8], %10 {strides = array<i32>} : memref<32x128xf32, #tpu.memory_space<vmem>>, vector<32x128xf32>,
    return
  }
  func.func @transform_0(%arg0: i32) -> (i32, i32) {
    %c0_i32 = arith.constant 0 : i32
    %c0_i32_0 = arith.constant 0 : i32
    return %arg0, %c0_i32 : i32, i32
  }
  func.func @transform_1(%arg0: i32) -> (i32, i32) {
    %c0_i32 = arith.constant 0 : i32
    %c0_i32_0 = arith.constant 0 : i32
    %c0_i32_1 = arith.constant 0 : i32
    return %c0_i32, %c0_i32_0 : i32, i32
  }
  func.func @transform_2(%arg0: i32) -> (i32, i32) {
    %c0_i32 = arith.constant 0 : i32
    %c0_i32_0 = arith.constant 0 : i32
    %c0_i32_1 = arith.constant 0 : i32
    return %c0_i32, %c0_i32_0 : i32, i32
  }
  func.func @transform_3(%arg0: i32) -> (i32, i32) {
    %c0_i32 = arith.constant 0 : i32
    %c0_i32_0 = arith.constant 0 : i32
    return %arg0, %c0_i32 : i32, i32
  }
}

module attributes {stable_mosaic.version = 11 : i64} {
  func.func @_convblock_kernel(%arg0: i32, %arg1: memref<64x256xbf16, #tpu.memory_space<vmem>>, %arg2: memref<256x128xbf16, #tpu.memory_space<vmem>>, %arg3: memref<1x128xf32, #tpu.memory_space<vmem>>, %arg4: memref<64x128xf32, #tpu.memory_space<vmem>>) attributes {dimension_semantics = [#tpu.dimension_semantics<parallel>], iteration_bounds = array<i64: 1>, scalar_prefetch = 0 : i64, scratch_operands = 0 : i64, tpu.core_type = #tpu.core_type<tc>, window_params = [{transform_indices = @transform_0, window_bounds = array<i64: 64, 256>}, {pipeline_mode = #tpu.pipeline_mode<synchronous>, transform_indices = @transform_1, window_bounds = array<i64: 256, 128>}, {pipeline_mode = #tpu.pipeline_mode<synchronous>, transform_indices = @transform_2, window_bounds = array<i64: 1, 128>}, {transform_indices = @transform_3, window_bounds = array<i64: 64, 128>}]} {
    %c0 = arith.constant 0 : index
    %c0_0 = arith.constant 0 : index
    %0 = vector.load %arg1[%c0, %c0_0] : memref<64x256xbf16, #tpu.memory_space<vmem>>, vector<64x256xbf16>
    %c0_1 = arith.constant 0 : index
    %c0_2 = arith.constant 0 : index
    %1 = vector.load %arg2[%c0_1, %c0_2] : memref<256x128xbf16, #tpu.memory_space<vmem>>, vector<256x128xbf16>
    %cst = arith.constant dense<0.000000e+00> : vector<64x128xf32>
    %2 = tpu.matmul %0, %1, %cst {dimension_numbers = #tpu.dot_dimension_numbers<[1], [0], [0], [1], [0, 0, 1, 1], [], []>} : vector<64x256xbf16>, vector<256x128xbf16>, vector<64x128xf32> -> vector<64x128xf32>
    %c0_3 = arith.constant 0 : index
    %c0_4 = arith.constant 0 : index
    %3 = vector.load %arg3[%c0_3, %c0_4] : memref<1x128xf32, #tpu.memory_space<vmem>>, vector<1x128xf32>
    %4 = vector.broadcast %3 : vector<1x128xf32> to vector<64x128xf32>
    %5 = arith.addf %2, %4 : vector<64x128xf32>
    %cst_5 = arith.constant 0.000000e+00 : f32
    %6 = vector.broadcast %cst_5 : f32 to vector<64x128xf32>
    %7 = arith.cmpf oge, %5, %6 : vector<64x128xf32>
    %cst_6 = arith.constant 2.000000e-01 : f32
    %8 = vector.broadcast %cst_6 : f32 to vector<64x128xf32>
    %9 = arith.mulf %8, %5 : vector<64x128xf32>
    %10 = arith.select %7, %5, %9 : vector<64x128xi1>, vector<64x128xf32>
    %c0_7 = arith.constant 0 : index
    %c0_8 = arith.constant 0 : index
    %11 = vector.load %arg4[%c0_7, %c0_8] : memref<64x128xf32, #tpu.memory_space<vmem>>, vector<64x128xf32>
    tpu.vector_store %arg4[%c0_7, %c0_8], %10 {strides = array<i32>} : memref<64x128xf32, #tpu.memory_space<vmem>>, vector<64x128xf32>,
    return
  }
  func.func @transform_0(%arg0: i32) -> (i32, i32) {
    %c0_i32 = arith.constant 0 : i32
    %c0_i32_0 = arith.constant 0 : i32
    return %arg0, %c0_i32 : i32, i32
  }
  func.func @transform_1(%arg0: i32) -> (i32, i32) {
    %c0_i32 = arith.constant 0 : i32
    %c0_i32_0 = arith.constant 0 : i32
    %c0_i32_1 = arith.constant 0 : i32
    return %c0_i32, %c0_i32_0 : i32, i32
  }
  func.func @transform_2(%arg0: i32) -> (i32, i32) {
    %c0_i32 = arith.constant 0 : i32
    %c0_i32_0 = arith.constant 0 : i32
    %c0_i32_1 = arith.constant 0 : i32
    return %c0_i32, %c0_i32_0 : i32, i32
  }
  func.func @transform_3(%arg0: i32) -> (i32, i32) {
    %c0_i32 = arith.constant 0 : i32
    %c0_i32_0 = arith.constant 0 : i32
    return %arg0, %c0_i32 : i32, i32
  }
}

module attributes {stable_mosaic.version = 11 : i64} {
  func.func @_convblock_kernel(%arg0: i32, %arg1: memref<32x512xbf16, #tpu.memory_space<vmem>>, %arg2: memref<512x128xbf16, #tpu.memory_space<vmem>>, %arg3: memref<1x128xf32, #tpu.memory_space<vmem>>, %arg4: memref<32x128xf32, #tpu.memory_space<vmem>>) attributes {dimension_semantics = [#tpu.dimension_semantics<parallel>], iteration_bounds = array<i64: 1>, scalar_prefetch = 0 : i64, scratch_operands = 0 : i64, tpu.core_type = #tpu.core_type<tc>, window_params = [{transform_indices = @transform_0, window_bounds = array<i64: 32, 512>}, {pipeline_mode = #tpu.pipeline_mode<synchronous>, transform_indices = @transform_1, window_bounds = array<i64: 512, 128>}, {pipeline_mode = #tpu.pipeline_mode<synchronous>, transform_indices = @transform_2, window_bounds = array<i64: 1, 128>}, {transform_indices = @transform_3, window_bounds = array<i64: 32, 128>}]} {
    %c0 = arith.constant 0 : index
    %c0_0 = arith.constant 0 : index
    %0 = vector.load %arg1[%c0, %c0_0] : memref<32x512xbf16, #tpu.memory_space<vmem>>, vector<32x512xbf16>
    %c0_1 = arith.constant 0 : index
    %c0_2 = arith.constant 0 : index
    %1 = vector.load %arg2[%c0_1, %c0_2] : memref<512x128xbf16, #tpu.memory_space<vmem>>, vector<512x128xbf16>
    %cst = arith.constant dense<0.000000e+00> : vector<32x128xf32>
    %2 = tpu.matmul %0, %1, %cst {dimension_numbers = #tpu.dot_dimension_numbers<[1], [0], [0], [1], [0, 0, 1, 1], [], []>} : vector<32x512xbf16>, vector<512x128xbf16>, vector<32x128xf32> -> vector<32x128xf32>
    %c0_3 = arith.constant 0 : index
    %c0_4 = arith.constant 0 : index
    %3 = vector.load %arg3[%c0_3, %c0_4] : memref<1x128xf32, #tpu.memory_space<vmem>>, vector<1x128xf32>
    %4 = vector.broadcast %3 : vector<1x128xf32> to vector<32x128xf32>
    %5 = arith.addf %2, %4 : vector<32x128xf32>
    %c0_5 = arith.constant 0 : index
    %c0_6 = arith.constant 0 : index
    %6 = vector.load %arg4[%c0_5, %c0_6] : memref<32x128xf32, #tpu.memory_space<vmem>>, vector<32x128xf32>
    tpu.vector_store %arg4[%c0_5, %c0_6], %5 {strides = array<i32>} : memref<32x128xf32, #tpu.memory_space<vmem>>, vector<32x128xf32>,
    return
  }
  func.func @transform_0(%arg0: i32) -> (i32, i32) {
    %c0_i32 = arith.constant 0 : i32
    %c0_i32_0 = arith.constant 0 : i32
    return %arg0, %c0_i32 : i32, i32
  }
  func.func @transform_1(%arg0: i32) -> (i32, i32) {
    %c0_i32 = arith.constant 0 : i32
    %c0_i32_0 = arith.constant 0 : i32
    %c0_i32_1 = arith.constant 0 : i32
    return %c0_i32, %c0_i32_0 : i32, i32
  }
  func.func @transform_2(%arg0: i32) -> (i32, i32) {
    %c0_i32 = arith.constant 0 : i32
    %c0_i32_0 = arith.constant 0 : i32
    %c0_i32_1 = arith.constant 0 : i32
    return %c0_i32, %c0_i32_0 : i32, i32
  }
  func.func @transform_3(%arg0: i32) -> (i32, i32) {
    %c0_i32 = arith.constant 0 : i32
    %c0_i32_0 = arith.constant 0 : i32
    return %arg0, %c0_i32 : i32, i32
  }
}

</mosaic_0001>

<bundles_post_ra>
// kernel: _lambda_.4
= control target key start
LH: loop header
LB: loop body
LE: loop exit
PB: predicated region body
PF: predicated region fallthrough
CT: control target
= control target key end

     0   :  { %s549_s1 = inlined_call_operand.vmem [shape: bf16[128,128], index: 1, kind: input, shape index: {}]   ;;  %s550_s0 = inlined_call_operand.vmem [shape: bf16[128,128], index: 0, kind: input, shape index: {}]   ;;  %s551_s2 = inlined_call_operand.vmem [shape: f32[1,128], index: 2, kind: input, shape index: {}]   ;;  %s552_s3 = inlined_call_operand.vmem [shape: f32[128,128], index: 3, kind: output, shape index: {}]  }
   0x1   :  { %v396_v0 = vld [vmem:[%s549_s1 + $0x38] sm:$0xff]   ;;  %v397_v1 = vld [vmem:[%s549_s1 + $0x30] sm:$0xff]   ;;  %v398_v2 = vld [vmem:[%s549_s1 + $0x28] sm:$0xff]  }
   0x2   :  { %348 = vmatprep.subr.bf16.mxu0 %v396_v0  ;;  %380 = vmatprep.subr.bf16.mxu1 %v396_v0  ;;  %v399_v3 = vld [vmem:[%s549_s1 + $0x20] sm:$0xff]   ;;  %v400_v6 = vld [vmem:[%s549_s1 + $0x18] sm:$0xff]   ;;  %v401_v7 = vld [vmem:[%s549_s1 + $0x10] sm:$0xff]  }
   0x3   :  { %349 = vmatpush3.bf16.msra.mxu0 %v396_v0  ;;  %388 = vmatpush3.bf16.msra.mxu1 %v396_v0  ;;  %v404_v4 = vld [vmem:[%s550_s0] sm:$0xff]   ;;  %v402_v8 = vld [vmem:[%s549_s1 + $0x8] sm:$0xff]   ;;  %v408_v12 = vld [vmem:[%s550_s0 + $0x10] sm:$0xff]  }
   0x4   :  { %350 = vmatprep.subr.bf16.mxu0 %v397_v1  ;;  %381 = vmatprep.subr.bf16.mxu1 %v397_v1  ;;  %v405_v5 = vld [vmem:[%s550_s0 + $0x20] sm:$0xff]   ;;  %v406_v10 = vld [vmem:[%s550_s0 + $0x8] sm:$0xff]   ;;  %v409_v13 = vld [vmem:[%s550_s0 + $0x30] sm:$0xff]  }
   0x5   :  { %364 = vmatprep.mubr.bf16.mxu0 %v404_v4  ;;  %372 = vmatprep.mubr.bf16.mxu1 %v405_v5  ;;  %v403_v9 = vld [vmem:[%s549_s1] sm:$0xff]   ;;  %v407_v11 = vld [vmem:[%s550_s0 + $0x28] sm:$0xff]   ;;  %v410_v14 = vld [vmem:[%s550_s0 + $0x18] sm:$0xff]  }
   0x6   :  { %v411_v15 = vld [vmem:[%s550_s0 + $0x38] sm:$0xff]   ;;  %v483_v16 = vld [vmem:[%s551_s2] ss:$0 sm:$0xff] }
   0x7   :  { %351 = vmatpush3.bf16.msra.mxu0 %v397_v1  ;;  %389 = vmatpush3.bf16.msra.mxu1 %v397_v1 }
   0x8   :  { %352 = vmatprep.subr.bf16.mxu0 %v398_v2  ;;  %382 = vmatprep.subr.bf16.mxu1 %v398_v2 }
   0xb   :  { %353 = vmatpush3.bf16.msra.mxu0 %v398_v2  ;;  %390 = vmatpush3.bf16.msra.mxu1 %v398_v2 }
   0xc   :  { %354 = vmatprep.subr.bf16.mxu0 %v399_v3  ;;  %383 = vmatprep.subr.bf16.mxu1 %v399_v3 }
   0xf   :  { %355 = vmatpush3.bf16.msra.mxu0 %v399_v3  ;;  %391 = vmatpush3.bf16.msra.mxu1 %v399_v3 }
  0x10   :  { %356 = vmatprep.subr.bf16.mxu0 %v400_v6  ;;  %384 = vmatprep.subr.bf16.mxu1 %v400_v6 }
  0x13   :  { %357 = vmatpush3.bf16.msra.mxu0 %v400_v6  ;;  %392 = vmatpush3.bf16.msra.mxu1 %v400_v6 }
  0x14   :  { %358 = vmatprep.subr.bf16.mxu0 %v401_v7  ;;  %385 = vmatprep.subr.bf16.mxu1 %v401_v7 }
  0x17   :  { %359 = vmatpush3.bf16.msra.mxu0 %v401_v7  ;;  %393 = vmatpush3.bf16.msra.mxu1 %v401_v7 }
  0x18   :  { %360 = vmatprep.subr.bf16.mxu0 %v402_v8  ;;  %386 = vmatprep.subr.bf16.mxu1 %v402_v8 }
  0x1b   :  { %361 = vmatpush3.bf16.msra.mxu0 %v402_v8  ;;  %394 = vmatpush3.bf16.msra.mxu1 %v402_v8 }
  0x1c   :  { %362 = vmatprep.subr.bf16.mxu0 %v403_v9  ;;  %387 = vmatprep.subr.bf16.mxu1 %v403_v9 }
  0x1f   :  { %363 = vmatpush3.bf16.msra.mxu0 %v403_v9  ;;  %395 = vmatpush3.bf16.msra.mxu1 %v403_v9 }
  0x22   :  { %365 = vmatmul.mubr.bf16.vlgmr.msra.gmra.mxu0 %v406_v10  ;;  %373 = vmatmul.mubr.bf16.vlgmr.msra.gmra.mxu1 %v407_v11 }
  0x23   :  { %368 = vmatprep.mubr.bf16.mxu0 %v408_v12  ;;  %376 = vmatprep.mubr.bf16.mxu1 %v409_v13 }
  0x2a   :  { %369 = vmatmul.mubr.bf16.gmra.mxu0 %v410_v14  ;;  %377 = vmatmul.mubr.bf16.gmra.mxu1 %v411_v15 }
  0xe2   :  { %v366_v17 = vpop.f32.mrf.mxu0  ;;  %v374_v18 = vpop.f32.mrf.mxu1 }
  0xe3   :  { %v193_v19 = vadd.f32 %v366_v17, %v483_v16  ;;  %v225_v20 = vadd.f32 %v374_v18, %v483_v16 }
  0xe4   :  { %v184_v21 = vpop.f32.mrf.mxu0  ;;  %v216_v22 = vpop.f32.mrf.mxu1 }
  0xe5   :  { %vm249_vm0 = vcmp.ge.f32.partialorder %v193_v19, 0.0  ;;  %v265_v23 = vmul.f32 0.2, %v193_v19  ;;  %vm257_vm1 = vcmp.ge.f32.partialorder %v225_v20, 0.0  ;;  %v273_v24 = vmul.f32 0.2, %v225_v20 }
  0xe6   :  { %v185_v25 = vadd.f32 %v483_v16, %v184_v21  ;;  %v217_v26 = vadd.f32 %v483_v16, %v216_v22  ;;  %v367_v27 = vpop.f32.mrf.mxu0  ;;  %v375_v28 = vpop.f32.mrf.mxu1 }
  0xe7   :  { %v281_v29 = vsel %vm249_vm0, %v193_v19, %v265_v23  ;;  %v289_v30 = vsel %vm257_vm1, %v225_v20, %v273_v24  ;;  %v196_v31 = vadd.f32 %v367_v27, %v483_v16  ;;  %v228_v32 = vadd.f32 %v375_v28, %v483_v16 }
  0xe8   :  { %297 = vst [vmem:[%s552_s3 + $0x10] sm:$0xff] %v281_v29  ;;  %305 = vst [vmem:[%s552_s3 + $0x50] sm:$0xff] %v289_v30  ;;  %vm247_vm2 = vcmp.ge.f32.partialorder %v185_v25, 0.0  ;;  %v263_v33 = vmul.f32 0.2, %v185_v25  ;;  %vm255_vm3 = vcmp.ge.f32.partialorder %v217_v26, 0.0  ;;  %v187_v35 = vpop.f32.mrf.mxu0  ;;  %v219_v36 = vpop.f32.mrf.mxu1 }
  0xe9   :  { %v271_v34 = vmul.f32 0.2, %v217_v26  ;;  %vm250_vm4 = vcmp.ge.f32.partialorder %v196_v31, 0.0  ;;  %v266_v37 = vmul.f32 0.2, %v196_v31  ;;  %vm258_vm5 = vcmp.ge.f32.partialorder %v228_v32, 0.0 }
  0xea   :  { %v274_v38 = vmul.f32 0.2, %v228_v32  ;;  %v279_v39 = vsel %vm247_vm2, %v185_v25, %v263_v33  ;;  %v188_v41 = vadd.f32 %v483_v16, %v187_v35  ;;  %v220_v42 = vadd.f32 %v483_v16, %v219_v36  ;;  %v370_v43 = vpop.f32.mrf.mxu0  ;;  %v378_v44 = vpop.f32.mrf.mxu1 }
  0xeb   :  { %v287_v40 = vsel %vm255_vm3, %v217_v26, %v271_v34  ;;  %295 = vst [vmem:[%s552_s3] sm:$0xff] %v279_v39  ;;  %v282_v45 = vsel %vm250_vm4, %v196_v31, %v266_v37  ;;  %v209_v47 = vadd.f32 %v370_v43, %v483_v16  ;;  %v241_v48 = vadd.f32 %v378_v44, %v483_v16 }
  0xec   :  { %303 = vst [vmem:[%s552_s3 + $0x40] sm:$0xff] %v287_v40  ;;  %v290_v46 = vsel %vm258_vm5, %v228_v32, %v274_v38  ;;  %298 = vst [vmem:[%s552_s3 + $0x18] sm:$0xff] %v282_v45  ;;  %vm248_vm6 = vcmp.ge.f32.partialorder %v188_v41, 0.0  ;;  %v264_v49 = vmul.f32 0.2, %v188_v41  ;;  %vm256_vm7 = vcmp.ge.f32.partialorder %v220_v42, 0.0  ;;  %v200_v51 = vpop.f32.mrf.mxu0  ;;  %v232_v52 = vpop.f32.mrf.mxu1 }
  0xed   :  { %306 = vst [vmem:[%s552_s3 + $0x58] sm:$0xff] %v290_v46  ;;  %v272_v50 = vmul.f32 0.2, %v220_v42  ;;  %vm253_vm8 = vcmp.ge.f32.partialorder %v209_v47, 0.0  ;;  %v269_v53 = vmul.f32 0.2, %v209_v47  ;;  %v201_v57 = vadd.f32 %v483_v16, %v200_v51 }
  0xee   :  { %vm261_vm9 = vcmp.ge.f32.partialorder %v241_v48, 0.0  ;;  %v277_v54 = vmul.f32 0.2, %v241_v48  ;;  %v280_v55 = vsel %vm248_vm6, %v188_v41, %v264_v49  ;;  %v233_v58 = vadd.f32 %v483_v16, %v232_v52  ;;  %v371_v59 = vpop.f32.mrf.mxu0  ;;  %v379_v60 = vpop.f32.mrf.mxu1 }
  0xef   :  { %v288_v56 = vsel %vm256_vm7, %v220_v42, %v272_v50  ;;  %296 = vst [vmem:[%s552_s3 + $0x8] sm:$0xff] %v280_v55  ;;  %v285_v61 = vsel %vm253_vm8, %v209_v47, %v269_v53  ;;  %v212_v63 = vadd.f32 %v371_v59, %v483_v16  ;;  %v244_v0 = vadd.f32 %v379_v60, %v483_v16 }
  0xf0   :  { %304 = vst [vmem:[%s552_s3 + $0x48] sm:$0xff] %v288_v56  ;;  %v293_v62 = vsel %vm261_vm9, %v241_v48, %v277_v54  ;;  %301 = vst [vmem:[%s552_s3 + $0x30] sm:$0xff] %v285_v61  ;;  %vm251_vm10 = vcmp.ge.f32.partialorder %v201_v57, 0.0  ;;  %v267_v1 = vmul.f32 0.2, %v201_v57  ;;  %vm259_vm11 = vcmp.ge.f32.partialorder %v233_v58, 0.0  ;;  %v203_v3 = vpop.f32.mrf.mxu0  ;;  %v235_v4 = vpop.f32.mrf.mxu1 }
  0xf1   :  { %309 = vst [vmem:[%s552_s3 + $0x70] sm:$0xff] %v293_v62  ;;  %v275_v2 = vmul.f32 0.2, %v233_v58  ;;  %vm254_vm12 = vcmp.ge.f32.partialorder %v212_v63, 0.0  ;;  %v270_v5 = vmul.f32 0.2, %v212_v63  ;;  %v204_v9 = vadd.f32 %v483_v16, %v203_v3 }
  0xf2   :  { %vm262_vm13 = vcmp.ge.f32.partialorder %v244_v0, 0.0  ;;  %v278_v6 = vmul.f32 0.2, %v244_v0  ;;  %v283_v7 = vsel %vm251_vm10, %v201_v57, %v267_v1  ;;  %v236_v10 = vadd.f32 %v483_v16, %v235_v4 }
  0xf3   :  { %v291_v8 = vsel %vm259_vm11, %v233_v58, %v275_v2  ;;  %299 = vst [vmem:[%s552_s3 + $0x20] sm:$0xff] %v283_v7  ;;  %v286_v11 = vsel %vm254_vm12, %v212_v63, %v270_v5  ;;  %vm252_vm14 = vcmp.ge.f32.partialorder %v204_v9, 0.0  ;;  %v268_v13 = vmul.f32 0.2, %v204_v9 }
  0xf4   :  { %307 = vst [vmem:[%s552_s3 + $0x60] sm:$0xff] %v291_v8  ;;  %v294_v12 = vsel %vm262_vm13, %v244_v0, %v278_v6  ;;  %302 = vst [vmem:[%s552_s3 + $0x38] sm:$0xff] %v286_v11  ;;  %vm260_vm15 = vcmp.ge.f32.partialorder %v236_v10, 0.0  ;;  %v276_v14 = vmul.f32 0.2, %v236_v10 }
  0xf5   :  { %310 = vst [vmem:[%s552_s3 + $0x78] sm:$0xff] %v294_v12  ;;  %v284_v15 = vsel %vm252_vm14, %v204_v9, %v268_v13 }
  0xf6   :  { %v292_v16 = vsel %vm260_vm15, %v236_v10, %v276_v14  ;;  %300 = vst [vmem:[%s552_s3 + $0x28] sm:$0xff] %v284_v15 }
  0xf7   :  { %308 = vst [vmem:[%s552_s3 + $0x68] sm:$0xff] %v292_v16 }

// kernel: _lambda_.5
= control target key start
LH: loop header
LB: loop body
LE: loop exit
PB: predicated region body
PF: predicated region fallthrough
CT: control target
= control target key end

     0   :  { %s287_s1 = inlined_call_operand.vmem [shape: bf16[128,128], index: 1, kind: input, shape index: {}]   ;;  %s288_s0 = inlined_call_operand.vmem [shape: bf16[32,128], index: 0, kind: input, shape index: {}]   ;;  %s289_s2 = inlined_call_operand.vmem [shape: f32[1,128], index: 2, kind: input, shape index: {}]   ;;  %s290_s3 = inlined_call_operand.vmem [shape: f32[32,128], index: 3, kind: output, shape index: {}]  }
   0x1   :  { %v212_v0 = vld [vmem:[%s287_s1 + $0x38] sm:$0xff]   ;;  %v213_v1 = vld [vmem:[%s287_s1 + $0x30] sm:$0xff]   ;;  %v214_v2 = vld [vmem:[%s287_s1 + $0x28] sm:$0xff]  }
   0x2   :  { %192 = vmatprep.subr.bf16.mxu0 %v212_v0  ;;  %v215_v3 = vld [vmem:[%s287_s1 + $0x20] sm:$0xff]   ;;  %v216_v5 = vld [vmem:[%s287_s1 + $0x18] sm:$0xff]   ;;  %v217_v6 = vld [vmem:[%s287_s1 + $0x10] sm:$0xff]  }
   0x3   :  { %193 = vmatpush3.bf16.msra.mxu0 %v212_v0  ;;  %v220_v4 = vld [vmem:[%s288_s0] sm:$0xff]   ;;  %v218_v7 = vld [vmem:[%s287_s1 + $0x8] sm:$0xff]  }
   0x4   :  { %194 = vmatprep.subr.bf16.mxu0 %v213_v1  ;;  %208 = vmatprep.mubr.bf16.mxu0 %v220_v4  ;;  %v219_v8 = vld [vmem:[%s287_s1] sm:$0xff]   ;;  %v221_v9 = vld [vmem:[%s288_s0 + $0x8] sm:$0xff]  }
   0x5   :  { %v171_v10 = vld [vmem:[%s289_s2] ss:$0 sm:$0xff] }
   0x7   :  { %195 = vmatpush3.bf16.msra.mxu0 %v213_v1 }
   0x8   :  { %196 = vmatprep.subr.bf16.mxu0 %v214_v2 }
   0xb   :  { %197 = vmatpush3.bf16.msra.mxu0 %v214_v2 }
   0xc   :  { %198 = vmatprep.subr.bf16.mxu0 %v215_v3 }
   0xf   :  { %199 = vmatpush3.bf16.msra.mxu0 %v215_v3 }
  0x10   :  { %200 = vmatprep.subr.bf16.mxu0 %v216_v5 }
  0x13   :  { %201 = vmatpush3.bf16.msra.mxu0 %v216_v5 }
  0x14   :  { %202 = vmatprep.subr.bf16.mxu0 %v217_v6 }
  0x17   :  { %203 = vmatpush3.bf16.msra.mxu0 %v217_v6 }
  0x18   :  { %204 = vmatprep.subr.bf16.mxu0 %v218_v7 }
  0x1b   :  { %205 = vmatpush3.bf16.msra.mxu0 %v218_v7 }
  0x1c   :  { %206 = vmatprep.subr.bf16.mxu0 %v219_v8 }
  0x1f   :  { %207 = vmatpush3.bf16.msra.mxu0 %v219_v8 }
  0x22   :  { %209 = vmatmul.mubr.bf16.vlgmr.msra.gmra.mxu0 %v221_v9 }
  0xe2   :  { %v210_v11 = vpop.f32.mrf.mxu0 }
  0xe3   :  { %v145_v12 = vadd.f32 %v210_v11, %v171_v10 }
  0xe4   :  { %v136_v13 = vpop.f32.mrf.mxu0 }
  0xe5   :  { %vm153_vm0 = vcmp.ge.f32.partialorder %v145_v12, 0.0  ;;  %v157_v14 = vmul.f32 0.2, %v145_v12  ;;  %v137_v15 = vadd.f32 %v171_v10, %v136_v13 }
  0xe6   :  { %v211_v16 = vpop.f32.mrf.mxu0 }
  0xe7   :  { %v161_v17 = vsel %vm153_vm0, %v145_v12, %v157_v14  ;;  %vm151_vm1 = vcmp.ge.f32.partialorder %v137_v15, 0.0  ;;  %v155_v18 = vmul.f32 0.2, %v137_v15  ;;  %v148_v19 = vadd.f32 %v211_v16, %v171_v10 }
  0xe8   :  { %165 = vst [vmem:[%s290_s3 + $0x10] sm:$0xff] %v161_v17  ;;  %v139_v20 = vpop.f32.mrf.mxu0 }
  0xe9   :  { %v159_v21 = vsel %vm151_vm1, %v137_v15, %v155_v18  ;;  %vm154_vm2 = vcmp.ge.f32.partialorder %v148_v19, 0.0  ;;  %v158_v22 = vmul.f32 0.2, %v148_v19  ;;  %v140_v23 = vadd.f32 %v171_v10, %v139_v20 }
  0xea   :  { %163 = vst [vmem:[%s290_s3] sm:$0xff] %v159_v21 }
  0xeb   :  { %v162_v24 = vsel %vm154_vm2, %v148_v19, %v158_v22  ;;  %vm152_vm3 = vcmp.ge.f32.partialorder %v140_v23, 0.0  ;;  %v156_v25 = vmul.f32 0.2, %v140_v23 }
  0xec   :  { %166 = vst [vmem:[%s290_s3 + $0x18] sm:$0xff] %v162_v24 }
  0xed   :  { %v160_v26 = vsel %vm152_vm3, %v140_v23, %v156_v25 }
  0xee   :  { %164 = vst [vmem:[%s290_s3 + $0x8] sm:$0xff] %v160_v26 }

// kernel: _lambda_.6
= control target key start
LH: loop header
LB: loop body
LE: loop exit
PB: predicated region body
PF: predicated region fallthrough
CT: control target
= control target key end

     0   :  { %s527_s1 = inlined_call_operand.vmem [shape: bf16[256,128], index: 1, kind: input, shape index: {}]   ;;  %s528_s0 = inlined_call_operand.vmem [shape: bf16[64,256], index: 0, kind: input, shape index: {}]   ;;  %s529_s2 = inlined_call_operand.vmem [shape: f32[1,128], index: 2, kind: input, shape index: {}]   ;;  %s530_s3 = inlined_call_operand.vmem [shape: f32[64,128], index: 3, kind: output, shape index: {}]  }
   0x1   :  { %v380_v0 = vld [vmem:[%s527_s1 + $0x78] sm:$0xff]   ;;  %v382_v2 = vld [vmem:[%s527_s1 + $0x70] sm:$0xff]   ;;  %v384_v4 = vld [vmem:[%s527_s1 + $0x68] sm:$0xff]  }
   0x2   :  { %v381_v1 = vld [vmem:[%s527_s1 + $0x38] sm:$0xff]   ;;  %324 = vmatprep.subr.bf16.mxu0 %v380_v0  ;;  %364 = vmatprep.subr.bf16.mxu1 %v380_v0  ;;  %v383_v3 = vld [vmem:[%s527_s1 + $0x30] sm:$0xff]   ;;  %v385_v5 = vld [vmem:[%s527_s1 + $0x28] sm:$0xff]  }
   0x3   :  { %325 = vmatpush3.bf16.msra.mxu0 %v381_v1  ;;  %372 = vmatpush3.bf16.msra.mxu1 %v381_v1  ;;  %v386_v6 = vld [vmem:[%s527_s1 + $0x60] sm:$0xff]   ;;  %v388_v8 = vld [vmem:[%s527_s1 + $0x58] sm:$0xff]   ;;  %v390_v10 = vld [vmem:[%s527_s1 + $0x50] sm:$0xff]  }
   0x4   :  { %326 = vmatprep.subr.bf16.mxu0 %v382_v2  ;;  %365 = vmatprep.subr.bf16.mxu1 %v382_v2  ;;  %v387_v7 = vld [vmem:[%s527_s1 + $0x20] sm:$0xff]   ;;  %v389_v9 = vld [vmem:[%s527_s1 + $0x18] sm:$0xff]   ;;  %v391_v13 = vld [vmem:[%s527_s1 + $0x10] sm:$0xff]  }
   0x5   :  { %v398_v11 = vld [vmem:[%s528_s0 + $0x4] ss:$8 sps:$4 sm:$0xff]   ;;  %v396_v18 = vld [vmem:[%s528_s0] ss:$8 sps:$4 sm:$0xff]   ;;  %v402_v20 = vld [vmem:[%s528_s0 + $0x14] ss:$8 sps:$4 sm:$0xff]  }
   0x6   :  { %v401_v12 = vld [vmem:[%s528_s0 + $0x24] ss:$8 sps:$4 sm:$0xff]   ;;  %230 = vmatprep.mubr.bf16.mxu0 %v398_v11  ;;  %v399_v19 = vld [vmem:[%s528_s0 + $0x20] ss:$8 sps:$4 sm:$0xff]   ;;  %v404_v21 = vld [vmem:[%s528_s0 + $0x34] ss:$8 sps:$4 sm:$0xff]  }
   0x7   :  { %327 = vmatpush3.bf16.msra.mxu0 %v383_v3  ;;  %373 = vmatpush3.bf16.msra.mxu1 %v383_v3  ;;  %v392_v14 = vld [vmem:[%s527_s1 + $0x48] sm:$0xff]   ;;  %v394_v16 = vld [vmem:[%s527_s1 + $0x40] sm:$0xff]   ;;  %v406_v22 = vld [vmem:[%s528_s0 + $0x10] ss:$8 sps:$4 sm:$0xff]  }
   0x8   :  { %328 = vmatprep.subr.bf16.mxu0 %v384_v4  ;;  %366 = vmatprep.subr.bf16.mxu1 %v384_v4  ;;  %v393_v15 = vld [vmem:[%s527_s1 + $0x8] sm:$0xff]   ;;  %v395_v17 = vld [vmem:[%s527_s1] sm:$0xff]   ;;  %v407_v23 = vld [vmem:[%s528_s0 + $0x30] ss:$8 sps:$4 sm:$0xff]  }
   0x9   :  { %246 = vmatprep.mubr.bf16.mxu1 %v401_v12  ;;  %v299_v26 = vld [vmem:[%s529_s2] ss:$0 sm:$0xff] }
   0xb   :  { %329 = vmatpush3.bf16.msra.mxu0 %v385_v5  ;;  %374 = vmatpush3.bf16.msra.mxu1 %v385_v5 }
   0xc   :  { %330 = vmatprep.subr.bf16.mxu0 %v386_v6  ;;  %367 = vmatprep.subr.bf16.mxu1 %v386_v6 }
   0xf   :  { %331 = vmatpush3.bf16.msra.mxu0 %v387_v7  ;;  %375 = vmatpush3.bf16.msra.mxu1 %v387_v7 }
  0x10   :  { %332 = vmatprep.subr.bf16.mxu0 %v388_v8  ;;  %368 = vmatprep.subr.bf16.mxu1 %v388_v8 }
  0x13   :  { %333 = vmatpush3.bf16.msra.mxu0 %v389_v9  ;;  %376 = vmatpush3.bf16.msra.mxu1 %v389_v9 }
  0x14   :  { %334 = vmatprep.subr.bf16.mxu0 %v390_v10  ;;  %369 = vmatprep.subr.bf16.mxu1 %v390_v10 }
  0x17   :  { %335 = vmatpush3.bf16.msra.mxu0 %v391_v13  ;;  %377 = vmatpush3.bf16.msra.mxu1 %v391_v13 }
  0x18   :  { %336 = vmatprep.subr.bf16.mxu0 %v392_v14  ;;  %370 = vmatprep.subr.bf16.mxu1 %v392_v14 }
  0x1b   :  { %337 = vmatpush3.bf16.msra.mxu0 %v393_v15  ;;  %378 = vmatpush3.bf16.msra.mxu1 %v393_v15 }
  0x1c   :  { %338 = vmatprep.subr.bf16.mxu0 %v394_v16  ;;  %371 = vmatprep.subr.bf16.mxu1 %v394_v16 }
  0x1f   :  { %339 = vmatpush3.bf16.msra.mxu0 %v395_v17  ;;  %379 = vmatpush3.bf16.msra.mxu1 %v395_v17 }
  0x22   :  { %231 = vmatmul.mubr.bf16.vlgmr.msra.gmra.mxu0 %v396_v18  ;;  %247 = vmatmul.mubr.bf16.vlgmr.msra.gmra.mxu1 %v399_v19 }
  0x23   :  { %238 = vmatprep.mubr.bf16.mxu0 %v402_v20  ;;  %254 = vmatprep.mubr.bf16.mxu1 %v404_v21 }
  0x2a   :  { %239 = vmatmul.mubr.bf16.gmra.mxu0 %v406_v22  ;;  %255 = vmatmul.mubr.bf16.gmra.mxu1 %v407_v23 }
  0xe2   :  { %v340_v24 = vpop.f32.mrf.mxu0  ;;  %v352_v25 = vpop.f32.mrf.mxu1 }
  0xe4   :  { %v341_v27 = vpop.f32.mrf.mxu0  ;;  %v353_v28 = vpop.f32.mrf.mxu1 }
  0xe5   :  { %v342_v29 = vadd.f32 %v341_v27, %v340_v24  ;;  %v354_v30 = vadd.f32 %v353_v28, %v352_v25 }
  0xe6   :  { %v343_v31 = vpop.f32.mrf.mxu0  ;;  %v355_v32 = vpop.f32.mrf.mxu1 }
  0xe7   :  { %v233_v33 = vadd.f32 %v342_v29, %v299_v26  ;;  %v249_v34 = vadd.f32 %v354_v30, %v299_v26 }
  0xe8   :  { %v344_v35 = vpop.f32.mrf.mxu0  ;;  %v356_v36 = vpop.f32.mrf.mxu1 }
  0xe9   :  { %vm263_vm0 = vcmp.ge.f32.partialorder %v233_v33, 0.0  ;;  %v271_v37 = vmul.f32 0.2, %v233_v33  ;;  %vm267_vm1 = vcmp.ge.f32.partialorder %v249_v34, 0.0  ;;  %v275_v38 = vmul.f32 0.2, %v249_v34 }
  0xea   :  { %v345_v39 = vadd.f32 %v344_v35, %v343_v31  ;;  %v357_v40 = vadd.f32 %v356_v36, %v355_v32  ;;  %v346_v41 = vpop.f32.mrf.mxu0  ;;  %v358_v42 = vpop.f32.mrf.mxu1 }
  0xeb   :  { %v279_v43 = vsel %vm263_vm0, %v233_v33, %v271_v37  ;;  %v283_v44 = vsel %vm267_vm1, %v249_v34, %v275_v38 }
  0xec   :  { %287 = vst [vmem:[%s530_s3] sm:$0xff] %v279_v43  ;;  %291 = vst [vmem:[%s530_s3 + $0x20] sm:$0xff] %v283_v44  ;;  %v236_v45 = vadd.f32 %v345_v39, %v299_v26  ;;  %v252_v46 = vadd.f32 %v357_v40, %v299_v26  ;;  %v347_v47 = vpop.f32.mrf.mxu0  ;;  %v359_v48 = vpop.f32.mrf.mxu1 }
  0xed   :  { %v348_v49 = vadd.f32 %v347_v47, %v346_v41  ;;  %v360_v50 = vadd.f32 %v359_v48, %v358_v42 }
  0xee   :  { %vm264_vm2 = vcmp.ge.f32.partialorder %v236_v45, 0.0  ;;  %v272_v51 = vmul.f32 0.2, %v236_v45  ;;  %vm268_vm3 = vcmp.ge.f32.partialorder %v252_v46, 0.0  ;;  %v276_v52 = vmul.f32 0.2, %v252_v46  ;;  %v349_v53 = vpop.f32.mrf.mxu0  ;;  %v361_v54 = vpop.f32.mrf.mxu1 }
  0xef   :  { %v241_v55 = vadd.f32 %v348_v49, %v299_v26  ;;  %v257_v56 = vadd.f32 %v360_v50, %v299_v26 }
  0xf0   :  { %v280_v57 = vsel %vm264_vm2, %v236_v45, %v272_v51  ;;  %v284_v58 = vsel %vm268_vm3, %v252_v46, %v276_v52  ;;  %v350_v59 = vpop.f32.mrf.mxu0  ;;  %v362_v60 = vpop.f32.mrf.mxu1 }
  0xf1   :  { %288 = vst [vmem:[%s530_s3 + $0x8] sm:$0xff] %v280_v57  ;;  %292 = vst [vmem:[%s530_s3 + $0x28] sm:$0xff] %v284_v58  ;;  %vm265_vm4 = vcmp.ge.f32.partialorder %v241_v55, 0.0  ;;  %v273_v61 = vmul.f32 0.2, %v241_v55  ;;  %vm269_vm5 = vcmp.ge.f32.partialorder %v257_v56, 0.0  ;;  %v351_v63 = vadd.f32 %v350_v59, %v349_v53 }
  0xf2   :  { %v277_v62 = vmul.f32 0.2, %v257_v56  ;;  %v363_v0 = vadd.f32 %v362_v60, %v361_v54 }
  0xf3   :  { %v281_v1 = vsel %vm265_vm4, %v241_v55, %v273_v61  ;;  %v244_v3 = vadd.f32 %v351_v63, %v299_v26 }
  0xf4   :  { %v285_v2 = vsel %vm269_vm5, %v257_v56, %v277_v62  ;;  %289 = vst [vmem:[%s530_s3 + $0x10] sm:$0xff] %v281_v1  ;;  %v260_v4 = vadd.f32 %v363_v0, %v299_v26 }
  0xf5   :  { %293 = vst [vmem:[%s530_s3 + $0x30] sm:$0xff] %v285_v2  ;;  %vm266_vm6 = vcmp.ge.f32.partialorder %v244_v3, 0.0  ;;  %v274_v5 = vmul.f32 0.2, %v244_v3 }
  0xf6   :  { %vm270_vm7 = vcmp.ge.f32.partialorder %v260_v4, 0.0  ;;  %v278_v6 = vmul.f32 0.2, %v260_v4 }
  0xf7   :  { %v282_v7 = vsel %vm266_vm6, %v244_v3, %v274_v5 }
  0xf8   :  { %v286_v8 = vsel %vm270_vm7, %v260_v4, %v278_v6  ;;  %290 = vst [vmem:[%s530_s3 + $0x18] sm:$0xff] %v282_v7 }
  0xf9   :  { %294 = vst [vmem:[%s530_s3 + $0x38] sm:$0xff] %v286_v8 }

// kernel: _lambda_.7
= control target key start
LH: loop header
LB: loop body
LE: loop exit
PB: predicated region body
PF: predicated region fallthrough
CT: control target
= control target key end

     0   :  { %s728_s1 = inlined_call_operand.vmem [shape: bf16[512,128], index: 1, kind: input, shape index: {}]   ;;  %s729_s0 = inlined_call_operand.vmem [shape: bf16[32,512], index: 0, kind: input, shape index: {}]   ;;  %s730_s2 = inlined_call_operand.vmem [shape: f32[1,128], index: 2, kind: input, shape index: {}]   ;;  %s731_s3 = inlined_call_operand.vmem [shape: f32[32,128], index: 3, kind: output, shape index: {}]  }
   0x1   :  { %v529_v0 = vld [vmem:[%s728_s1 + $0x78] sm:$0xff]   ;;  %v533_v4 = vld [vmem:[%s728_s1 + $0x70] sm:$0xff]   ;;  %v537_v8 = vld [vmem:[%s728_s1 + $0x68] sm:$0xff]  }
   0x2   :  { %v530_v1 = vld [vmem:[%s728_s1 + $0xf8] sm:$0xff]   ;;  %473 = vmatprep.subr.bf16.mxu0 %v529_v0  ;;  %v534_v5 = vld [vmem:[%s728_s1 + $0xf0] sm:$0xff]   ;;  %v538_v9 = vld [vmem:[%s728_s1 + $0xe8] sm:$0xff]  }
   0x3   :  { %v531_v2 = vld [vmem:[%s728_s1 + $0x38] sm:$0xff]   ;;  %501 = vmatprep.subr.bf16.mxu1 %v530_v1  ;;  %v535_v6 = vld [vmem:[%s728_s1 + $0x30] sm:$0xff]   ;;  %v539_v10 = vld [vmem:[%s728_s1 + $0x28] sm:$0xff]  }
   0x4   :  { %v532_v3 = vld [vmem:[%s728_s1 + $0xb8] sm:$0xff]   ;;  %474 = vmatpush3.bf16.msra.mxu0 %v531_v2  ;;  %v536_v7 = vld [vmem:[%s728_s1 + $0xb0] sm:$0xff]   ;;  %v540_v11 = vld [vmem:[%s728_s1 + $0xa8] sm:$0xff]  }
   0x5   :  { %502 = vmatpush3.bf16.msra.mxu1 %v532_v3  ;;  %475 = vmatprep.subr.bf16.mxu0 %v533_v4  ;;  %v541_v12 = vld [vmem:[%s728_s1 + $0x60] sm:$0xff]   ;;  %v545_v16 = vld [vmem:[%s728_s1 + $0x58] sm:$0xff]   ;;  %v549_v20 = vld [vmem:[%s728_s1 + $0x50] sm:$0xff]  }
   0x6   :  { %503 = vmatprep.subr.bf16.mxu1 %v534_v5  ;;  %v542_v13 = vld [vmem:[%s728_s1 + $0xe0] sm:$0xff]   ;;  %v546_v17 = vld [vmem:[%s728_s1 + $0xd8] sm:$0xff]   ;;  %v550_v21 = vld [vmem:[%s728_s1 + $0xd0] sm:$0xff]  }
   0x7   :  { %v543_v14 = vld [vmem:[%s728_s1 + $0x20] sm:$0xff]   ;;  %v547_v18 = vld [vmem:[%s728_s1 + $0x18] sm:$0xff]   ;;  %v551_v22 = vld [vmem:[%s728_s1 + $0x10] sm:$0xff]  }
   0x8   :  { %476 = vmatpush3.bf16.msra.mxu0 %v535_v6  ;;  %v544_v15 = vld [vmem:[%s728_s1 + $0xa0] sm:$0xff]   ;;  %v548_v19 = vld [vmem:[%s728_s1 + $0x98] sm:$0xff]   ;;  %v552_v23 = vld [vmem:[%s728_s1 + $0x90] sm:$0xff]  }
   0x9   :  { %504 = vmatpush3.bf16.msra.mxu1 %v536_v7  ;;  %477 = vmatprep.subr.bf16.mxu0 %v537_v8  ;;  %v553_v24 = vld [vmem:[%s728_s1 + $0x48] sm:$0xff]   ;;  %v557_v28 = vld [vmem:[%s728_s1 + $0x40] sm:$0xff]  }
   0xa   :  { %505 = vmatprep.subr.bf16.mxu1 %v538_v9  ;;  %v554_v25 = vld [vmem:[%s728_s1 + $0xc8] sm:$0xff]   ;;  %v558_v29 = vld [vmem:[%s728_s1 + $0xc0] sm:$0xff]  }
   0xb   :  { %v555_v26 = vld [vmem:[%s728_s1 + $0x8] sm:$0xff]   ;;  %v559_v30 = vld [vmem:[%s728_s1] sm:$0xff]  }
   0xc   :  { %478 = vmatpush3.bf16.msra.mxu0 %v539_v10  ;;  %v556_v27 = vld [vmem:[%s728_s1 + $0x88] sm:$0xff]   ;;  %v560_v31 = vld [vmem:[%s728_s1 + $0x80] sm:$0xff]  }
   0xd   :  { %506 = vmatpush3.bf16.msra.mxu1 %v540_v11  ;;  %479 = vmatprep.subr.bf16.mxu0 %v541_v12  ;;  %v561_v32 = vld [vmem:[%s729_s0] ss:$16 sps:$4 sm:$0xff]   ;;  %v563_v33 = vld [vmem:[%s729_s0 + $0x4] ss:$16 sps:$4 sm:$0xff]   ;;  %v564_v34 = vld [vmem:[%s729_s0 + $0x8] ss:$16 sps:$4 sm:$0xff]  }
   0xe   :  { %507 = vmatprep.subr.bf16.mxu1 %v542_v13  ;;  %v566_v35 = vld [vmem:[%s729_s0 + $0xc] ss:$16 sps:$4 sm:$0xff]   ;;  %358 = vmatprep.mubr.bf16.mxu0 %v563_v33  ;;  %v567_v36 = vld [vmem:[%s729_s0 + $0x24] ss:$16 sps:$4 sm:$0xff]   ;;  %v571_v38 = vld [vmem:[%s729_s0 + $0x20] ss:$16 sps:$4 sm:$0xff]  }
   0xf   :  { %407 = vmatprep.mubr.bf16.mxu1 %v566_v35  ;;  %v569_v37 = vld [vmem:[%s729_s0 + $0x2c] ss:$16 sps:$4 sm:$0xff]   ;;  %v572_v39 = vld [vmem:[%s729_s0 + $0x28] ss:$16 sps:$4 sm:$0xff]   ;;  %v432_v42 = vld [vmem:[%s730_s2] ss:$0 sm:$0xff] }
  0x10   :  { %480 = vmatpush3.bf16.msra.mxu0 %v543_v14 }
  0x11   :  { %508 = vmatpush3.bf16.msra.mxu1 %v544_v15  ;;  %481 = vmatprep.subr.bf16.mxu0 %v545_v16 }
  0x12   :  { %509 = vmatprep.subr.bf16.mxu1 %v546_v17 }
  0x14   :  { %482 = vmatpush3.bf16.msra.mxu0 %v547_v18 }
  0x15   :  { %510 = vmatpush3.bf16.msra.mxu1 %v548_v19  ;;  %483 = vmatprep.subr.bf16.mxu0 %v549_v20 }
  0x16   :  { %511 = vmatprep.subr.bf16.mxu1 %v550_v21 }
  0x18   :  { %484 = vmatpush3.bf16.msra.mxu0 %v551_v22 }
  0x19   :  { %512 = vmatpush3.bf16.msra.mxu1 %v552_v23  ;;  %485 = vmatprep.subr.bf16.mxu0 %v553_v24 }
  0x1a   :  { %513 = vmatprep.subr.bf16.mxu1 %v554_v25 }
  0x1c   :  { %486 = vmatpush3.bf16.msra.mxu0 %v555_v26 }
  0x1d   :  { %514 = vmatpush3.bf16.msra.mxu1 %v556_v27  ;;  %487 = vmatprep.subr.bf16.mxu0 %v557_v28 }
  0x1e   :  { %515 = vmatprep.subr.bf16.mxu1 %v558_v29 }
  0x20   :  { %488 = vmatpush3.bf16.msra.mxu0 %v559_v30 }
  0x21   :  { %516 = vmatpush3.bf16.msra.mxu1 %v560_v31 }
  0x23   :  { %359 = vmatmul.mubr.bf16.vlgmr.msra.gmra.mxu0 %v561_v32 }
  0x24   :  { %408 = vmatmul.mubr.bf16.vlgmr.msra.gmra.mxu1 %v564_v34  ;;  %366 = vmatprep.mubr.bf16.mxu0 %v567_v36 }
  0x25   :  { %415 = vmatprep.mubr.bf16.mxu1 %v569_v37 }
  0x2b   :  { %367 = vmatmul.mubr.bf16.gmra.mxu0 %v571_v38 }
  0x2c   :  { %416 = vmatmul.mubr.bf16.gmra.mxu1 %v572_v39 }
  0xe3   :  { %v489_v40 = vpop.f32.mrf.mxu0 }
  0xe4   :  { %v517_v41 = vpop.f32.mrf.mxu1 }
  0xe5   :  { %v490_v43 = vpop.f32.mrf.mxu0 }
  0xe6   :  { %v491_v44 = vadd.f32 %v490_v43, %v489_v40  ;;  %v518_v45 = vpop.f32.mrf.mxu1 }
  0xe7   :  { %v492_v46 = vpop.f32.mrf.mxu0  ;;  %v519_v48 = vadd.f32 %v518_v45, %v517_v41 }
  0xe8   :  { %v361_v47 = vadd.f32 %v491_v44, %v432_v42  ;;  %v520_v49 = vpop.f32.mrf.mxu1 }
  0xe9   :  { %v493_v50 = vpop.f32.mrf.mxu0 }
  0xea   :  { %v410_v51 = vadd.f32 %v519_v48, %v361_v47  ;;  %v494_v52 = vadd.f32 %v493_v50, %v492_v46  ;;  %v521_v53 = vpop.f32.mrf.mxu1 }
  0xeb   :  { %v495_v54 = vpop.f32.mrf.mxu0  ;;  %v522_v56 = vadd.f32 %v521_v53, %v520_v49 }
  0xec   :  { %424 = vst [vmem:[%s731_s3] sm:$0xff] %v410_v51  ;;  %v364_v55 = vadd.f32 %v494_v52, %v432_v42  ;;  %v523_v57 = vpop.f32.mrf.mxu1 }
  0xed   :  { %v496_v58 = vpop.f32.mrf.mxu0 }
  0xee   :  { %v413_v59 = vadd.f32 %v522_v56, %v364_v55  ;;  %v497_v60 = vadd.f32 %v496_v58, %v495_v54  ;;  %v524_v61 = vpop.f32.mrf.mxu1 }
  0xef   :  { %v498_v62 = vpop.f32.mrf.mxu0  ;;  %v525_v0 = vadd.f32 %v524_v61, %v523_v57 }
  0xf0   :  { %425 = vst [vmem:[%s731_s3 + $0x8] sm:$0xff] %v413_v59  ;;  %v369_v63 = vadd.f32 %v497_v60, %v432_v42  ;;  %v526_v1 = vpop.f32.mrf.mxu1 }
  0xf1   :  { %v499_v2 = vpop.f32.mrf.mxu0 }
  0xf2   :  { %v418_v3 = vadd.f32 %v525_v0, %v369_v63  ;;  %v500_v4 = vadd.f32 %v499_v2, %v498_v62  ;;  %v527_v5 = vpop.f32.mrf.mxu1 }
  0xf3   :  { %v528_v7 = vadd.f32 %v527_v5, %v526_v1 }
  0xf4   :  { %426 = vst [vmem:[%s731_s3 + $0x10] sm:$0xff] %v418_v3  ;;  %v372_v6 = vadd.f32 %v500_v4, %v432_v42 }
  0xf6   :  { %v421_v8 = vadd.f32 %v528_v7, %v372_v6 }
  0xf8   :  { %427 = vst [vmem:[%s731_s3 + $0x18] sm:$0xff] %v421_v8 }

</bundles_post_ra>
